<compile_context>
chip_gen: v7x
topology: tpu7x:2x2x1
jax: 0.10.0
libtpu: 0.0.40
codegen_flags: <defaults>
</compile_context>

<pallas_src>
import functools

import jax
import jax.numpy as jnp
import numpy as np
from jax.experimental import pallas as pl
from jax.experimental.pallas import tpu as pltpu


def _round_up(x, m):
    return -(-x // m) * m


def _tpu_hw():
    """Best-effort TPU generation query (safe fallbacks if unknown)."""
    kind = ""
    try:
        kind = jax.devices()[0].device_kind.lower()
    except Exception:
        pass
    mxu_n = 256 if ("v6" in kind or "v7" in kind) else 128  # v5e/v5p/v4: 128-wide MXU
    n_tc = 2 if "v7" in kind else 1                          # v7x: 2 TensorCores/chip
    try:
        vmem_phys = pltpu.get_tpu_info().vmem_capacity_bytes
    except Exception:
        vmem_phys = 64 << 20                                 # conservative (v7x) fallback
    return mxu_n, n_tc, vmem_phys


# ---------------------------------------------------------------------------
# Pallas kernel: one grid step == one batch tile x one block of trees.
# ---------------------------------------------------------------------------
def forest_kernel(x_ref, w_ref, b_ref, pi_ref, sel_ref, off_ref, out_ref,
                  *, depth, tn, operand_dtype):
    tb = pl.program_id(1)          # tree-block index (innermost, "arbitrary")

    # 1) Decision logits for every tree in the block with ONE wide MXU matmul.
    logits = jnp.dot(x_ref[...], w_ref[0],
                     preferred_element_type=jnp.float32) + b_ref[0]   # [B, tn]

    # 2) sigmoid(z) = 0.5*(tanh(z/2)+1): tanh runs on the EUP slot, freeing
    #    VALU slots vs. the abs/exp/reciprocal/select formulation. Stable.
    decision = 0.5 * (jnp.tanh(0.5 * logits) + 1.0)                   # [B, tn] f32

    # 3) All `depth` routing levels fused into a single MXU matmul against a
    #    block-diagonal (over trees) selection matrix. LHS stays f32: sel is
    #    exactly +-1/0, so the routing factors are near-exact and bf16 error
    #    cannot compound multiplicatively over the depth product.
    factors = (jnp.dot(decision, sel_ref[...],
                       preferred_element_type=jnp.float32)
               + off_ref[...])                                        # [B, depth*tn]

    mu = factors[:, :tn]
    for n in range(1, depth):                 # static unroll (depth is small)
        mu = mu * factors[:, n * tn:(n + 1) * tn]

    # 4) concat_t(mu_t) @ vstack_t(softmax(pi_t)/n_tree) == sum over the
    #    block's trees (and the 1/n_tree scale), in one matmul.
    p = jnp.dot(mu.astype(operand_dtype), pi_ref[0],
                preferred_element_type=jnp.float32)                   # [B, n_class]

    # 5) Accumulate directly into the output block: its block index depends
    #    only on the batch axis, so it stays VMEM-resident across tb.
    @pl.when(tb == 0)
    def _():
        out_ref[...] = jnp.zeros_like(out_ref)

    out_ref[...] += p


# ---------------------------------------------------------------------------
# Routing tables (structural, parameter-free): one fused selection matrix.
#   decision @ sel_cat + off_cat  ->  [B, depth * tn] routing factors.
# ---------------------------------------------------------------------------
def make_routing_tables(depth, tree_block):
    n_leaf = 2 ** depth
    sel = np.zeros((depth, n_leaf, n_leaf), np.float32)
    off = np.zeros((depth, n_leaf), np.float32)
    for n in range(depth):
        for l in range(n_leaf):
            bit = (l >> (depth - 1 - n)) & 1      # path choice at level n
            prefix = l >> (depth - n)             # internal node within level
            node = (1 << n) + prefix              # index into `decision`
            sel[n, node, l] = 1.0 - 2.0 * bit     # +d or -d
            off[n, l] = float(bit)                # ... + 1 when bit == 1
    eye_t = np.eye(tree_block, dtype=np.float32)
    # Block-diagonal over trees (routing structure identical for all trees).
    sel_cat = np.concatenate([np.kron(eye_t, sel[n]) for n in range(depth)],
                             axis=1)                       # [tn, depth*tn]
    off_cat = np.concatenate([np.tile(off[n], tree_block)
                              for n in range(depth)])[None, :]   # [1, depth*tn]
    return jnp.asarray(sel_cat), jnp.asarray(off_cat)


# ---------------------------------------------------------------------------
# Wrapper: parameter preprocessing (batch-independent) + pallas_call.
# ---------------------------------------------------------------------------
def forest_forward(x, feature_mask, w, b, pi, *, depth,
                   tree_block=None, batch_tile=None,
                   param_dtype=jnp.bfloat16):
    n_tree, n_in, _ = feature_mask.shape
    n_leaf = w.shape[-1]
    n_class = pi.shape[-1]
    batch = x.shape[0]
    assert n_leaf == 2 ** depth

    mxu_n, n_tc, vmem_phys = _tpu_hw()

    # --- fold the (0/1) feature mask into W; precompute softmax(pi)/n_tree ---
    w_eff = jnp.einsum('tiu,tul->til', feature_mask, w)   # [T, n_in, n_leaf]
    pi_sm = jax.nn.softmax(pi, axis=-1) * (1.0 / n_tree)  # [T, n_leaf, n_class]

    # --- tree blocking so each grid step fills the MXU N axis ---------------
    if tree_block is None:
        tree_block = max(1, mxu_n // n_leaf)               # tn ~ MXU width
        # don't pad far past what n_tree actually needs (small forests)
        tree_block = min(tree_block,
                         max(1, _round_up(n_tree * n_leaf, 128) // n_leaf))
        # keep the (f32, double-buffered) sel matrix within a modest VMEM slice
        while tree_block > 1 and depth * (tree_block * n_leaf) ** 2 * 8 > (12 << 20):
            tree_block //= 2
    n_blk = -(-n_tree // tree_block)
    n_pad = n_blk * tree_block - n_tree
    if n_pad:
        # Padded trees: W=b=0 -> decision=0.5; pi rows = 0 -> they contribute 0.
        w_eff = jnp.concatenate(
            [w_eff, jnp.zeros((n_pad, n_in, n_leaf), w_eff.dtype)], axis=0)
        b = jnp.concatenate(
            [b, jnp.zeros((n_pad, 1, n_leaf), b.dtype)], axis=0)
        pi_sm = jnp.concatenate(
            [pi_sm, jnp.zeros((n_pad, n_leaf, n_class), pi_sm.dtype)], axis=0)

    tn = tree_block * n_leaf
    w_cat = (w_eff.reshape(n_blk, tree_block, n_in, n_leaf)
                  .transpose(0, 2, 1, 3).reshape(n_blk, n_in, tn))
    b_cat = (b.reshape(n_blk, tree_block, 1, n_leaf)
              .transpose(0, 2, 1, 3).reshape(n_blk, 1, tn))
    pi_cat = pi_sm.reshape(n_blk, tn, n_class)

    sel_cat, off_cat = make_routing_tables(depth, tree_block)

    # MXU operand dtypes: decision & pi matmuls in param_dtype (bf16 default ->
    # 2x MXU throughput, half param DMA); routing matmul stays f32 (exact sel).
    x_c = x.astype(param_dtype)
    w_cat = w_cat.astype(param_dtype)
    pi_cat = pi_cat.astype(param_dtype)
    b_cat = b_cat.astype(jnp.float32)
    sel_cat = sel_cat.astype(jnp.float32)
    off_cat = off_cat.astype(jnp.float32)

    # --- batch tiling: pad to a multiple of the tile; keep the "parallel"
    # batch axis populated with >= n_tc steps (v7x has 2 TensorCores) ---------
    if batch_tile is None:
        batch_tile = min(256, _round_up(batch, 8))         # sweep winner ~256
    batch_tile = _round_up(batch_tile, 8)
    if n_tc > 1:
        per_core = _round_up(-(-batch // n_tc), 8)
        batch_tile = max(8, min(batch_tile, per_core))
    n_bt = -(-batch // batch_tile)
    batch_pad = n_bt * batch_tile
    if batch_pad != batch:
        x_c = jnp.pad(x_c, ((0, batch_pad - batch), (0, 0)))

    # --- explicit VMEM budget (double-buffered inputs + f32 intermediates) ---
    ob = np.dtype(param_dtype).itemsize
    budget = (2 * batch_tile * n_in * ob            # x tiles
              + 2 * n_in * tn * ob                  # W'
              + 2 * tn * 4                          # b
              + 2 * tn * n_class * ob               # softmax(pi)/T
              + 2 * tn * depth * tn * 4             # sel (f32)
              + 2 * depth * tn * 4                  # off
              + 2 * batch_tile * n_class * 4        # out
              + batch_tile * (depth + 3) * tn * 4)  # live f32 intermediates
    vmem_limit = int(min(max(2 * budget, 32 << 20), int(vmem_phys * 0.9)))

    kernel = functools.partial(forest_kernel, depth=depth, tn=tn,
                               operand_dtype=param_dtype)

    # TODO(synk): for very deep forests (depth >= ~7) keep sel in HBM
    # (memory_space=pl.ANY) and DMA it once into a single resident VMEM buffer
    # instead of the double-buffered grid-constant BlockSpec below.
    out = pl.pallas_call(
        kernel,
        out_shape=jax.ShapeDtypeStruct((batch_pad, n_class), jnp.float32),
        grid_spec=pltpu.PrefetchScalarGridSpec(
            num_scalar_prefetch=0,
            grid=(n_bt, n_blk),
            in_specs=[
                pl.BlockSpec((batch_tile, n_in), lambda bi, tb: (bi, 0)),      # x
                pl.BlockSpec((1, n_in, tn), lambda bi, tb: (tb, 0, 0)),        # W'
                pl.BlockSpec((1, 1, tn), lambda bi, tb: (tb, 0, 0)),           # b
                pl.BlockSpec((1, tn, n_class), lambda bi, tb: (tb, 0, 0)),     # softmax(pi)/T
                pl.BlockSpec((tn, depth * tn), lambda bi, tb: (0, 0)),         # sel (const)
                pl.BlockSpec((1, depth * tn), lambda bi, tb: (0, 0)),          # off (const)
            ],
            out_specs=pl.BlockSpec((batch_tile, n_class), lambda bi, tb: (bi, 0)),
        ),
        compiler_params=pltpu.CompilerParams(
            dimension_semantics=("parallel", "arbitrary"),
            vmem_limit_bytes=vmem_limit),
    )(x_c, w_cat, b_cat, pi_cat, sel_cat, off_cat)

    return out[:batch] if batch_pad != batch else out


# ---------------------------------------------------------------------------
# Parameter construction (deterministic, mirrors Tree.__init__)
# ---------------------------------------------------------------------------
def make_forest_params(key, n_tree, depth, n_in, feature_rate, n_class):
    n_used = int(n_in * feature_rate)
    n_leaf = 2 ** depth
    masks, ws, bs, pis = [], [], [], []
    eye = jnp.eye(n_in, dtype=jnp.float32)
    bound = 1.0 / np.sqrt(n_used)
    for _ in range(n_tree):
        key, k1, k2, k3, k4 = jax.random.split(key, 5)
        using_idx = jax.random.permutation(k1, n_in)[:n_used]
        masks.append(eye[:, using_idx])                               # [n_in, n_used]
        ws.append(jax.random.uniform(k2, (n_used, n_leaf), jnp.float32,
                                     -bound, bound))
        bs.append(jax.random.uniform(k3, (1, n_leaf), jnp.float32,
                                     -bound, bound))
        pis.append(jax.random.uniform(k4, (n_leaf, n_class), jnp.float32))
    return (jnp.stack(masks), jnp.stack(ws), jnp.stack(bs), jnp.stack(pis),
            n_used, n_leaf)


# ---------------------------------------------------------------------------
# Pure-JAX reference (mirrors the PyTorch code exactly) for verification
# ---------------------------------------------------------------------------
def forest_reference(x, masks, ws, bs, pis, depth, n_tree):
    n_leaf = 2 ** depth
    batch = x.shape[0]
    probs = []
    for t in range(n_tree):
        feats = x @ masks[t]
        decision = jax.nn.sigmoid(feats @ ws[t] + bs[t])              # [B, n_leaf]
        decision = jnp.stack([decision, 1.0 - decision], axis=2)      # [B, n_leaf, 2]
        mu = jnp.ones((batch, 1, 1), jnp.float32)
        begin, end = 1, 2
        for n in range(depth):
            mu = jnp.repeat(mu.reshape(batch, -1, 1), 2, axis=2)
            mu = mu * decision[:, begin:end, :]
            begin = end
            end = begin + 2 ** (n + 1)
        mu = mu.reshape(batch, n_leaf)
        pi_sm = jax.nn.softmax(pis[t], axis=-1)
        probs.append(mu @ pi_sm)
    return sum(probs) / n_tree


# ---------------------------------------------------------------------------
if __name__ == "__main__":
    # Config consistent with Forest(n_tree, depth, n_in, rate, n_class, True)
    n_tree, depth, n_in, feature_rate, n_class = 3, 3, 16, 0.5, 4
    batch = 8

    key = jax.random.PRNGKey(0)
    key, kx, kp = jax.random.split(key, 3)
    x = jax.random.normal(kx, (batch, n_in), jnp.float32)

    masks, ws, bs, pis, n_used, n_leaf = make_forest_params(
        kp, n_tree, depth, n_in, feature_rate, n_class)

    ref = forest_reference(x, masks, ws, bs, pis, depth, n_tree)

    # f32 MXU operands: tight numerical check (tanh-based sigmoid, f32 routing).
    out_f32 = jax.block_until_ready(
        forest_forward(x, masks, ws, bs, pis, depth=depth,
                       param_dtype=jnp.float32))
    np.testing.assert_allclose(np.asarray(out_f32), np.asarray(ref),
                               rtol=2e-4, atol=2e-4)

    # bf16 MXU operands (production default): loose check.
    out_bf16 = jax.block_until_ready(
        forest_forward(x, masks, ws, bs, pis, depth=depth,
                       param_dtype=jnp.bfloat16))
    np.testing.assert_allclose(np.asarray(out_bf16), np.asarray(ref),
                               rtol=5e-2, atol=5e-2)

    print("KERNEL_OK")
</pallas_src>

<mosaic_0001>
module attributes {stable_mosaic.version = 11 : i64} {
  func.func @forest_kernel(%arg0: i32, %arg1: i32, %arg2: memref<8x16xf32, #tpu.memory_space<vmem>>, %arg3: memref<1x16x128xf32, #tpu.memory_space<vmem>>, %arg4: memref<1x1x128xf32, #tpu.memory_space<vmem>>, %arg5: memref<1x128x4xf32, #tpu.memory_space<vmem>>, %arg6: memref<128x384xf32, #tpu.memory_space<vmem>>, %arg7: memref<1x384xf32, #tpu.memory_space<vmem>>, %arg8: memref<8x4xf32, #tpu.memory_space<vmem>>) attributes {dimension_semantics = [#tpu.dimension_semantics<parallel>, #tpu.dimension_semantics<arbitrary>], iteration_bounds = array<i64: 1, 1>, scalar_prefetch = 0 : i64, scratch_operands = 0 : i64, tpu.core_type = #tpu.core_type<tc>, window_params = [{transform_indices = @transform_0, window_bounds = array<i64: 8, 16>}, {transform_indices = @transform_1, window_bounds = array<i64: 1, 16, 128>}, {transform_indices = @transform_2, window_bounds = array<i64: 1, 1, 128>}, {transform_indices = @transform_3, window_bounds = array<i64: 1, 128, 4>}, {pipeline_mode = #tpu.pipeline_mode<synchronous>, transform_indices = @transform_4, window_bounds = array<i64: 128, 384>}, {pipeline_mode = #tpu.pipeline_mode<synchronous>, transform_indices = @transform_5, window_bounds = array<i64: 1, 384>}, {transform_indices = @transform_6, window_bounds = array<i64: 8, 4>}]} {
    %c0 = arith.constant 0 : index
    %c0_0 = arith.constant 0 : index
    %0 = vector.load %arg2[%c0, %c0_0] : memref<8x16xf32, #tpu.memory_space<vmem>>, vector<8x16xf32>
    %c0_1 = arith.constant 0 : index
    %c0_2 = arith.constant 0 : index
    %c0_3 = arith.constant 0 : index
    %1 = vector.load %arg3[%c0_1, %c0_2, %c0_3] : memref<1x16x128xf32, #tpu.memory_space<vmem>>, vector<1x16x128xf32>
    %2 = vector.shape_cast %1 : vector<1x16x128xf32> to vector<16x128xf32>
    %cst = arith.constant dense<0.000000e+00> : vector<8x128xf32>
    %3 = tpu.matmul %0, %2, %cst {dimension_numbers = #tpu.dot_dimension_numbers<[1], [0], [0], [1], [0, 0, 1, 1], [], []>} : vector<8x16xf32>, vector<16x128xf32>, vector<8x128xf32> -> vector<8x128xf32>
    %c0_4 = arith.constant 0 : index
    %c0_5 = arith.constant 0 : index
    %c0_6 = arith.constant 0 : index
    %4 = vector.load %arg4[%c0_4, %c0_5, %c0_6] : memref<1x1x128xf32, #tpu.memory_space<vmem>>, vector<1x1x128xf32>
    %5 = vector.shape_cast %4 : vector<1x1x128xf32> to vector<1x128xf32>
    %6 = vector.broadcast %5 : vector<1x128xf32> to vector<8x128xf32>
    %7 = arith.addf %3, %6 : vector<8x128xf32>
    %cst_7 = arith.constant 5.000000e-01 : f32
    %8 = vector.broadcast %cst_7 : f32 to vector<8x128xf32>
    %9 = arith.mulf %8, %7 : vector<8x128xf32>
    %10 = math.tanh %9 : vector<8x128xf32>
    %cst_8 = arith.constant 1.000000e+00 : f32
    %11 = vector.broadcast %cst_8 : f32 to vector<8x128xf32>
    %12 = arith.addf %10, %11 : vector<8x128xf32>
    %cst_9 = arith.constant 5.000000e-01 : f32
    %13 = vector.broadcast %cst_9 : f32 to vector<8x128xf32>
    %14 = arith.mulf %13, %12 : vector<8x128xf32>
    %c0_10 = arith.constant 0 : index
    %c0_11 = arith.constant 0 : index
    %15 = vector.load %arg6[%c0_10, %c0_11] : memref<128x384xf32, #tpu.memory_space<vmem>>, vector<128x384xf32>
    %cst_12 = arith.constant dense<0.000000e+00> : vector<8x384xf32>
    %16 = tpu.matmul %14, %15, %cst_12 {dimension_numbers = #tpu.dot_dimension_numbers<[1], [0], [0], [1], [0, 0, 1, 1], [], []>} : vector<8x128xf32>, vector<128x384xf32>, vector<8x384xf32> -> vector<8x384xf32>
    %c0_13 = arith.constant 0 : index
    %c0_14 = arith.constant 0 : index
    %17 = vector.load %arg7[%c0_13, %c0_14] : memref<1x384xf32, #tpu.memory_space<vmem>>, vector<1x384xf32>
    %18 = vector.broadcast %17 : vector<1x384xf32> to vector<8x384xf32>
    %19 = arith.addf %16, %18 : vector<8x384xf32>
    %20 = vector.extract_strided_slice %19 {offsets = [0, 0], sizes = [8, 128], strides = [1, 1]} : vector<8x384xf32> to vector<8x128xf32>
    %21 = vector.extract_strided_slice %19 {offsets = [0, 128], sizes = [8, 128], strides = [1, 1]} : vector<8x384xf32> to vector<8x128xf32>
    %22 = arith.mulf %20, %21 : vector<8x128xf32>
    %23 = vector.extract_strided_slice %19 {offsets = [0, 256], sizes = [8, 128], strides = [1, 1]} : vector<8x384xf32> to vector<8x128xf32>
    %24 = arith.mulf %22, %23 : vector<8x128xf32>
    %c0_15 = arith.constant 0 : index
    %c0_16 = arith.constant 0 : index
    %c0_17 = arith.constant 0 : index
    %25 = vector.load %arg5[%c0_15, %c0_16, %c0_17] : memref<1x128x4xf32, #tpu.memory_space<vmem>>, vector<1x128x4xf32>
    %26 = vector.shape_cast %25 : vector<1x128x4xf32> to vector<128x4xf32>
    %cst_18 = arith.constant dense<0.000000e+00> : vector<8x4xf32>
    %27 = tpu.matmul %24, %26, %cst_18 {dimension_numbers = #tpu.dot_dimension_numbers<[1], [0], [0], [1], [0, 0, 1, 1], [], []>} : vector<8x128xf32>, vector<128x4xf32>, vector<8x4xf32> -> vector<8x4xf32>
    %c0_i32 = arith.constant 0 : i32
    %28 = arith.cmpi eq, %arg1, %c0_i32 : i32
    %29 = arith.extui %28 : i1 to i32
    %c0_i32_19 = arith.constant 0 : i32
    %30 = arith.cmpi ne, %29, %c0_i32_19 : i32
    scf.if %30 {
      %cst_24 = arith.constant 0.000000e+00 : f32
      %34 = vector.broadcast %cst_24 : f32 to vector<8x4xf32>
      %c0_25 = arith.constant 0 : index
      %c0_26 = arith.constant 0 : index
      %35 = vector.load %arg8[%c0_25, %c0_26] : memref<8x4xf32, #tpu.memory_space<vmem>>, vector<8x4xf32>
      tpu.vector_store %arg8[%c0_25, %c0_26], %34 {strides = array<i32>} : memref<8x4xf32, #tpu.memory_space<vmem>>, vector<8x4xf32>,
    } else {
    }
    %c0_20 = arith.constant 0 : index
    %c0_21 = arith.constant 0 : index
    %31 = vector.load %arg8[%c0_20, %c0_21] : memref<8x4xf32, #tpu.memory_space<vmem>>, vector<8x4xf32>
    %32 = arith.addf %31, %27 : vector<8x4xf32>
    %c0_22 = arith.constant 0 : index
    %c0_23 = arith.constant 0 : index
    %33 = vector.load %arg8[%c0_22, %c0_23] : memref<8x4xf32, #tpu.memory_space<vmem>>, vector<8x4xf32>
    tpu.vector_store %arg8[%c0_22, %c0_23], %32 {strides = array<i32>} : memref<8x4xf32, #tpu.memory_space<vmem>>, vector<8x4xf32>,
    return
  }
  func.func @transform_0(%arg0: i32, %arg1: i32) -> (i32, i32) {
    %c0_i32 = arith.constant 0 : i32
    %c0_i32_0 = arith.constant 0 : i32
    return %arg0, %c0_i32 : i32, i32
  }
  func.func @transform_1(%arg0: i32, %arg1: i32) -> (i32, i32, i32) {
    %c0_i32 = arith.constant 0 : i32
    %c0_i32_0 = arith.constant 0 : i32
    %c0_i32_1 = arith.constant 0 : i32
    return %arg1, %c0_i32, %c0_i32_0 : i32, i32, i32
  }
  func.func @transform_2(%arg0: i32, %arg1: i32) -> (i32, i32, i32) {
    %c0_i32 = arith.constant 0 : i32
    %c0_i32_0 = arith.constant 0 : i32
    %c0_i32_1 = arith.constant 0 : i32
    return %arg1, %c0_i32, %c0_i32_0 : i32, i32, i32
  }
  func.func @transform_3(%arg0: i32, %arg1: i32) -> (i32, i32, i32) {
    %c0_i32 = arith.constant 0 : i32
    %c0_i32_0 = arith.constant 0 : i32
    %c0_i32_1 = arith.constant 0 : i32
    return %arg1, %c0_i32, %c0_i32_0 : i32, i32, i32
  }
  func.func @transform_4(%arg0: i32, %arg1: i32) -> (i32, i32) {
    %c0_i32 = arith.constant 0 : i32
    %c0_i32_0 = arith.constant 0 : i32
    %c0_i32_1 = arith.constant 0 : i32
    return %c0_i32, %c0_i32_0 : i32, i32
  }
  func.func @transform_5(%arg0: i32, %arg1: i32) -> (i32, i32) {
    %c0_i32 = arith.constant 0 : i32
    %c0_i32_0 = arith.constant 0 : i32
    %c0_i32_1 = arith.constant 0 : i32
    return %c0_i32, %c0_i32_0 : i32, i32
  }
  func.func @transform_6(%arg0: i32, %arg1: i32) -> (i32, i32) {
    %c0_i32 = arith.constant 0 : i32
    %c0_i32_0 = arith.constant 0 : i32
    return %arg0, %c0_i32 : i32, i32
  }
}

</mosaic_0001>

<bundles_post_ra>
// kernel: tpu_custom_call.1
= control target key start
LH: loop header
LB: loop body
LE: loop exit
PB: predicated region body
PF: predicated region fallthrough
CT: control target
= control target key end

     0   :  { %11 = vsyncpa [#allocation3], 0  ;;  %s665_s21 = smov [#allocation2]   ;;  %s818_s0 = inlined_call_operand.vmem [shape: f32[8,16], index: 0, kind: input, shape index: {}]   ;;  %s819_s1 = inlined_call_operand.vmem [shape: f32[1,16,128], index: 1, kind: input, shape index: {}]   ;;  %s820_s2 = inlined_call_operand.vmem [shape: f32[1,1,128], index: 2, kind: input, shape index: {}]   ;;  %s821_s3 = inlined_call_operand.vmem [shape: f32[1,128,4], index: 3, kind: input, shape index: {}]   ;;  %s822_s4 = inlined_call_operand.hbm [shape: f32[128,384], index: 4, kind: input, shape index: {}]   ;;  %s823_s5 = inlined_call_operand.vmem [shape: f32[1,384], index: 5, kind: input, shape index: {}]   ;;  %s824_s6 = inlined_call_operand.vmem [shape: f32[8,4], index: 6, kind: output, shape index: {}]  }
   0x1   :  { %s25_s22 = sshll.u32 %s665_s21, 4  ;;  %s641_s25 = scalar_lea.hbm %s822_s4, 6144  ;;  %s26_s22 = int_to_ptr.vmem [resolvable:$true] %s25_s22 }
   0x2   :  { %p642_p0 = scmp.ne.s32.totalorder %s822_s4, %s641_s25  ;;  %p645_p1 = scmp.lt.u32.totalorder %s641_s25, %s822_s4 }
   0x4   :  { %p647_p2 = pnand %p645_p1, %p642_p0 }
   0x6   :  { %650 = shalt.err (!%p647_p2)
}
   0x7   :  { %s651_s30 = scalar_lea.vmem %s26_s22, 6144  ;;  %p656_p4 = scmp.lt.s32.totalorder %s26_s22, %s26_s22 }
   0x8   :  { %p652_p3 = scmp.ne.s32.totalorder %s26_s22, %s651_s30  ;;  %p657_p5 = scmp.lt.s32.totalorder %s651_s30, %s651_s30 }
   0xa   :  { %p658_p6 = por %p657_p5, %p656_p4 }
   0xc   :  { %p659_p7 = pnand %p658_p6, %p652_p3 }
   0xe   :  { %662 = shalt.err (!%p659_p7)
}
   0xf   :  { %s666_s7 = smov 384   ;;  %s667_s8 = smov 24  }
  0x10   :  { %31 = dma.hbm_to_vmem [thread:$0]  %s822_s4, 6144, %s26_s22, [#allocation3], %s666_s7, %s666_s7, %s667_s8  }
  0x11   :  { %663 = dma.done.wait [#allocation3], 6144  }
  0x12   :  { %664 = vsyncadd [#allocation3], 4294961152  ;;  %vm423_vm0 = vcmask 31744   ;;  %v668_v0 = vmov 0.0|0.0   ;;  %vm669_vm1 = vmmov 0   ;;  %v670_v1 = vmov 0.0  }
  0x13   :  { %550 = vmatprep.subr.bf16.mxu0 %v668_v0  ;;  %477 = vmatprep.mubr.msk.f32.mxu0 %vm669_vm1, %v670_v1  ;;  %424 = vst.msk [vmem:[%s824_s6] sm:$0xff] %vm423_vm0, %v670_v1  ;;  %v38_v2 = vld [vmem:[%s819_s1] sm:$0xff]  ;;  %v39_v3 = vld [vmem:[%s819_s1 + $0x8] sm:$0xff]  ;;  %v128_v10 = vld [vmem:[#allocation2 + $0x18] sm:$0xff]  ;;  %vm47_vm2 = vcmask 130048  }
  0x14   :  { %254 = vmatprep.mubr.f32.mxu1 %v670_v1  ;;  %v551_v4 = vpack.c.bf16 %v39_v3, %v38_v2  ;;  %v37_v5 = vld [vmem:[%s818_s0] sm:$0xff]  ;;  %v126_v6 = vld [vmem:[#allocation2 + $0x8] sm:$0xff]  ;;  %v127_v11 = vld [vmem:[#allocation2 + $0x10] sm:$0xff] }
  0x15   :  { %v129_v7 = vld [vmem:[#allocation2 + $0x20] sm:$0xff]  ;;  %v130_v12 = vld [vmem:[#allocation2 + $0x28] sm:$0xff]  ;;  %v132_v15 = vld [vmem:[#allocation2 + $0x38] sm:$0xff] }
  0x16   :  { %v125_v8 = vld [vmem:[#allocation2] sm:$0xff]  ;;  %v553_v9 = vpack.c.bf16 %v129_v7, %v126_v6  ;;  %552 = vmatpush3.bf16.msra.mxu0 %v551_v4  ;;  %v586_v14 = vpack.c.bf16 %v130_v12, %v127_v11  ;;  %v135_v16 = vld [vmem:[#allocation2 + $0x50] sm:$0xff]  ;;  %v134_v19 = vld [vmem:[#allocation2 + $0x48] sm:$0xff] }
  0x17   :  { %v555_v13 = vpack.c.bf16 %v128_v10, %v125_v8  ;;  %v131_v17 = vld [vmem:[#allocation2 + $0x30] sm:$0xff]  ;;  %585 = vmatprep.subr.bf16.mxu0 %v668_v0  ;;  %v557_v18 = vpack.c.bf16 %v135_v16, %v132_v15  ;;  %v133_v20 = vld [vmem:[#allocation2 + $0x40] sm:$0xff]  ;;  %v136_v21 = vld [vmem:[#allocation2 + $0x58] sm:$0xff] }
  0x18   :  { %554 = vmatprep.subr.bf16.mxu1 %v553_v9  ;;  %v559_v22 = vpack.c.bf16 %v134_v19, %v131_v17  ;;  %v138_v23 = vld [vmem:[#allocation2 + $0x68] sm:$0xff]  ;;  %v141_v24 = vld [vmem:[#allocation2 + $0x80] sm:$0xff]  ;;  %v140_v27 = vld [vmem:[#allocation2 + $0x78] sm:$0xff]  ;;  %v589_v28 = vpack.c.bf16 %v136_v21, %v133_v20 }
  0x19   :  { %556 = vmatpush1.bf16.msra.mxu1 %v555_v13  ;;  %478 = vmatmul.mubr.msk.f32.vlgmr.msra.gmra.mrb[0].mxu0 %vm47_vm2, %v37_v5  ;;  %v561_v25 = vpack.c.bf16 %v141_v24, %v138_v23  ;;  %v137_v26 = vld [vmem:[#allocation2 + $0x60] sm:$0xff]  ;;  %v139_v29 = vld [vmem:[#allocation2 + $0x70] sm:$0xff]  ;;  %v142_v30 = vld [vmem:[#allocation2 + $0x88] sm:$0xff] }
  0x1a   :  { %558 = vmatprep.subr.bf16.mxu1 %v557_v18  ;;  %587 = vmatpush3.bf16.msra.mxu0 %v586_v14  ;;  %v563_v31 = vpack.c.bf16 %v140_v27, %v137_v26  ;;  %v592_v32 = vpack.c.bf16 %v142_v30, %v139_v29  ;;  %v144_v33 = vld [vmem:[#allocation2 + $0x98] sm:$0xff]  ;;  %v147_v34 = vld [vmem:[#allocation2 + $0xb0] sm:$0xff]  ;;  %v146_v37 = vld [vmem:[#allocation2 + $0xa8] sm:$0xff] }
  0x1b   :  { %512 = vmatprep.mubr.msk.f32.mxu0 %vm669_vm1, %v670_v1  ;;  %588 = vmatprep.subr.bf16.mxu0 %v668_v0  ;;  %v565_v35 = vpack.c.bf16 %v147_v34, %v144_v33  ;;  %v143_v36 = vld [vmem:[#allocation2 + $0x90] sm:$0xff]  ;;  %v145_v38 = vld [vmem:[#allocation2 + $0xa0] sm:$0xff]  ;;  %v148_v40 = vld [vmem:[#allocation2 + $0xb8] sm:$0xff] }
  0x1c   :  { %v567_v39 = vpack.c.bf16 %v146_v37, %v143_v36  ;;  %v595_v41 = vpack.c.bf16 %v148_v40, %v145_v38  ;;  %v150_v42 = vld [vmem:[#allocation2 + $0xc8] sm:$0xff]  ;;  %v153_v43 = vld [vmem:[#allocation2 + $0xe0] sm:$0xff]  ;;  %v152_v46 = vld [vmem:[#allocation2 + $0xd8] sm:$0xff] }
  0x1d   :  { %560 = vmatpush1.bf16.msra.mxu1 %v559_v22  ;;  %v569_v44 = vpack.c.bf16 %v153_v43, %v150_v42  ;;  %v149_v45 = vld [vmem:[#allocation2 + $0xc0] sm:$0xff]  ;;  %v151_v47 = vld [vmem:[#allocation2 + $0xd0] sm:$0xff]  ;;  %v154_v49 = vld [vmem:[#allocation2 + $0xe8] sm:$0xff] }
  0x1e   :  { %562 = vmatprep.subr.bf16.mxu1 %v561_v25  ;;  %590 = vmatpush3.bf16.msra.mxu0 %v589_v28  ;;  %v571_v48 = vpack.c.bf16 %v152_v46, %v149_v45  ;;  %v598_v50 = vpack.c.bf16 %v154_v49, %v151_v47  ;;  %v156_v51 = vld [vmem:[#allocation2 + $0xf8] sm:$0xff]  ;;  %v159_v52 = vld [vmem:[#allocation2 + $0x110] sm:$0xff]  ;;  %v158_v55 = vld [vmem:[#allocation2 + $0x108] sm:$0xff]  ;;  %v175_v47 = vlaneseq }
  0x1f   :  { %591 = vmatprep.subr.bf16.mxu0 %v668_v0  ;;  %v573_v53 = vpack.c.bf16 %v159_v52, %v156_v51  ;;  %v155_v54 = vld [vmem:[#allocation2 + $0xf0] sm:$0xff]  ;;  %v157_v56 = vld [vmem:[#allocation2 + $0x100] sm:$0xff]  ;;  %v160_v58 = vld [vmem:[#allocation2 + $0x118] sm:$0xff] }
  0x20   :  { %v575_v57 = vpack.c.bf16 %v158_v55, %v155_v54  ;;  %v601_v59 = vpack.c.bf16 %v160_v58, %v157_v56  ;;  %v162_v60 = vld [vmem:[#allocation2 + $0x128] sm:$0xff]  ;;  %v165_v61 = vld [vmem:[#allocation2 + $0x140] sm:$0xff]  ;;  %v164_v2 = vld [vmem:[#allocation2 + $0x138] sm:$0xff] }
  0x21   :  { %564 = vmatpush1.bf16.msra.mxu1 %v563_v31  ;;  %v577_v62 = vpack.c.bf16 %v165_v61, %v162_v60  ;;  %v161_v63 = vld [vmem:[#allocation2 + $0x120] sm:$0xff]  ;;  %v163_v3 = vld [vmem:[#allocation2 + $0x130] sm:$0xff]  ;;  %v166_v5 = vld [vmem:[#allocation2 + $0x148] sm:$0xff] }
  0x22   :  { %593 = vmatpush3.bf16.msra.mxu0 %v592_v32  ;;  %566 = vmatprep.subr.bf16.mxu1 %v565_v35  ;;  %v579_v4 = vpack.c.bf16 %v164_v2, %v161_v63  ;;  %v604_v6 = vpack.c.bf16 %v166_v5, %v163_v3  ;;  %v168_v7 = vld [vmem:[#allocation2 + $0x158] sm:$0xff]  ;;  %v171_v8 = vld [vmem:[#allocation2 + $0x170] sm:$0xff]  ;;  %v170_v11 = vld [vmem:[#allocation2 + $0x168] sm:$0xff] }
  0x23   :  { %594 = vmatprep.subr.bf16.mxu0 %v668_v0  ;;  %v581_v9 = vpack.c.bf16 %v171_v8, %v168_v7  ;;  %v167_v10 = vld [vmem:[#allocation2 + $0x150] sm:$0xff]  ;;  %v169_v12 = vld [vmem:[#allocation2 + $0x160] sm:$0xff]  ;;  %v172_v14 = vld [vmem:[#allocation2 + $0x178] sm:$0xff] }
  0x24   :  { %v583_v13 = vpack.c.bf16 %v170_v11, %v167_v10  ;;  %v607_v15 = vpack.c.bf16 %v172_v14, %v169_v12  ;;  %v434_v16 = vld [vmem:[%s820_s2] ss:$0 sm:$0xff]  ;;  %v334_v22 = vld [vmem:[%s821_s3 + $0x8] sm:$0xff]  ;;  %v335_v27 = vld [vmem:[%s821_s3 + $0x10] sm:$0xff] }
  0x25   :  { %568 = vmatpush1.bf16.msra.mxu1 %v567_v39  ;;  %v333_v21 = vld [vmem:[%s821_s3] sm:$0xff]  ;;  %v336_v28 = vld [vmem:[%s821_s3 + $0x18] sm:$0xff]  ;;  %v338_v31 = vld [vmem:[%s821_s3 + $0x28] sm:$0xff] }
  0x26   :  { %596 = vmatpush3.bf16.msra.mxu0 %v595_v41  ;;  %570 = vmatprep.subr.bf16.mxu1 %v569_v44  ;;  %v610_v25 = vpack.c.bf16 %v334_v22, %v333_v21  ;;  %v613_v29 = vpack.c.bf16 %v336_v28, %v335_v27  ;;  %v337_v30 = vld [vmem:[%s821_s3 + $0x20] sm:$0xff]  ;;  %v339_v33 = vld [vmem:[%s821_s3 + $0x30] sm:$0xff]  ;;  %v342_v36 = vld [vmem:[%s821_s3 + $0x48] sm:$0xff] }
  0x27   :  { %597 = vmatprep.subr.bf16.mxu0 %v668_v0  ;;  %v616_v32 = vpack.c.bf16 %v338_v31, %v337_v30  ;;  %v341_v35 = vld [vmem:[%s821_s3 + $0x40] sm:$0xff]  ;;  %v343_v38 = vld [vmem:[%s821_s3 + $0x50] sm:$0xff]  ;;  %v344_v39 = vld [vmem:[%s821_s3 + $0x58] sm:$0xff] }
  0x28   :  { %v622_v37 = vpack.c.bf16 %v342_v36, %v341_v35  ;;  %v625_v40 = vpack.c.bf16 %v344_v39, %v343_v38  ;;  %v345_v41 = vld [vmem:[%s821_s3 + $0x60] sm:$0xff]  ;;  %v346_v42 = vld [vmem:[%s821_s3 + $0x68] sm:$0xff]  ;;  %v347_v44 = vld [vmem:[%s821_s3 + $0x70] sm:$0xff] }
  0x29   :  { %572 = vmatpush1.bf16.msra.mxu1 %v571_v48  ;;  %v628_v43 = vpack.c.bf16 %v346_v42, %v345_v41  ;;  %v348_v45 = vld [vmem:[%s821_s3 + $0x78] sm:$0xff]  ;;  %v176_v48 = vshrl.u32 %v175_v47, 7  ;;  %v425_v2 = vld [vmem:[%s824_s6] sm:$0xff] }
  0x2a   :  { %599 = vmatpush3.bf16.msra.mxu0 %v598_v50  ;;  %574 = vmatprep.subr.bf16.mxu1 %v573_v53  ;;  %v631_v46 = vpack.c.bf16 %v348_v45, %v347_v44  ;;  %v173_v50 = vld [vmem:[%s823_s5] sm:$0x7] }
  0x2b   :  { %600 = vmatprep.subr.bf16.mxu0 %v668_v0  ;;  %v177_v49 = vsub.s32 0, %v176_v48  ;;  %v181_v51 = vsub.s32 1, %v176_v48  ;;  %v185_v52 = vsub.s32 2, %v176_v48 }
  0x2d   :  { %576 = vmatpush1.bf16.msra.mxu1 %v575_v57  ;;  %v182_v53 = vrot.slane %v173_v50, %v181_v51  ;;  %v186_v55 = vrot.slane %v173_v50, %v185_v52 }
  0x2e   :  { %602 = vmatpush3.bf16.msra.mxu0 %v601_v59  ;;  %578 = vmatprep.subr.bf16.mxu1 %v577_v62 }
  0x2f   :  { %603 = vmatprep.subr.bf16.mxu0 %v668_v0 }
  0x31   :  { %580 = vmatpush1.bf16.msra.mxu1 %v579_v4 }
  0x32   :  { %605 = vmatpush3.bf16.msra.mxu0 %v604_v6  ;;  %582 = vmatprep.subr.bf16.mxu1 %v581_v9 }
  0x33   :  { %606 = vmatprep.subr.bf16.mxu0 %v668_v0 }
  0x35   :  { %584 = vmatpush1.bf16.msra.mxu1 %v583_v13 }
  0x36   :  { %608 = vmatpush3.bf16.msra.mxu0 %v607_v15  ;;  %609 = vmatprep.subr.bf16.mxu1 %v668_v0 }
  0xec   :  { %v117_v17 = vpop.f32.mrb[0].mxu0 }
  0xed   :  { %v118_v18 = vadd.f32 %v434_v16, %v117_v17  ;;  %v479_v19 = vpop.f32.mrb[1].mxu0 }
  0xef   :  { %v121_v20 = vmul.f32 0.5, %v118_v18 }
  0xf1   :  { %639 = vtanh.f32 %v121_v20 }
  0xfb   :  { %v640_v23 = vpop.eup %639 }
  0xfc   :  { %v123_v24 = vadd.f32 1.0, %v640_v23 }
  0xfe   :  { %v124_v26 = vmul.f32 0.5, %v123_v24 }
 0x100   :  { %255 = vmatmul.mubr.f32.vlgmr.msra.gmra.mrb[0].mxu1 %v124_v26  ;;  %513 = vmatmul.mubr.f32.vlgmr.msra.gmra.mrb[2].mxu0 %v124_v26 }
 0x101   :  { %611 = vmatpush3.bf16.msra.mxu1 %v610_v25  ;;  %547 = vmatprep.mubr.msk.f32.mxu1 %vm669_vm1, %v670_v1  ;;  %v340_v1 = vld [vmem:[%s821_s3 + $0x38] sm:$0xff] }
 0x102   :  { %612 = vmatprep.subr.bf16.mxu1 %v668_v0  ;;  %v619_v34 = vpack.c.bf16 %v340_v1, %v339_v33 }
 0x105   :  { %614 = vmatpush3.bf16.msra.mxu1 %v613_v29 }
 0x106   :  { %615 = vmatprep.subr.bf16.mxu1 %v668_v0 }
 0x109   :  { %617 = vmatpush3.bf16.msra.mxu1 %v616_v32 }
 0x10a   :  { %618 = vmatprep.subr.bf16.mxu1 %v668_v0 }
 0x10d   :  { %620 = vmatpush3.bf16.msra.mxu1 %v619_v34 }
 0x10e   :  { %621 = vmatprep.subr.bf16.mxu1 %v668_v0 }
 0x111   :  { %623 = vmatpush3.bf16.msra.mxu1 %v622_v37 }
 0x112   :  { %624 = vmatprep.subr.bf16.mxu1 %v668_v0 }
 0x115   :  { %626 = vmatpush3.bf16.msra.mxu1 %v625_v40 }
 0x116   :  { %627 = vmatprep.subr.bf16.mxu1 %v668_v0 }
 0x119   :  { %629 = vmatpush3.bf16.msra.mxu1 %v628_v43 }
 0x11a   :  { %630 = vmatprep.subr.bf16.mxu1 %v668_v0  ;;  %v178_v0 = vrot.slane %v173_v50, %v177_v49 }
 0x11d   :  { %632 = vmatpush3.bf16.msra.mxu1 %v631_v46 }
 0x1d3   :  { %v256_v54 = vpop.f32.mrb[0].mxu1  ;;  %v327_v56 = vpop.f32.mrb[2].mxu0 }
 0x1d4   :  { %v257_v57 = vadd.f32 %v256_v54, %v178_v0  ;;  %v258_v58 = vpop.f32.mrb[1].mxu1  ;;  %v514_v59 = vpop.f32.mrb[3].mxu0  ;;  %v328_v61 = vadd.f32 %v327_v56, %v186_v55 }
 0x1d5   :  { %v259_v60 = vadd.f32 %v258_v58, %v182_v53 }
 0x1d7   :  { %v331_v62 = vmul.f32 %v259_v60, %v257_v57 }
 0x1d9   :  { %v332_v63 = vmul.f32 %v331_v62, %v328_v61 }
 0x1db   :  { %548 = vmatmul.mubr.f32.vlgmr.msra.gmra.mrb[2].mxu1 %v332_v63 }
 0x2ae   :  { %v415_v3 = vpop.f32.mrb[2].mxu1 }
 0x2af   :  { %v426_v4 = vadd.f32 %v425_v2, %v415_v3  ;;  %v549_v5 = vpop.f32.mrb[3].mxu1 }
 0x2b1   :  { %428 = vst.msk [vmem:[%s824_s6] sm:$0xff] %vm423_vm0, %v426_v4 }
 0x2b2   :  { %433 = vsyncpa [#allocation3], 1 }

</bundles_post_ra>
